<compile_context>
chip_gen: v5e
topology: v5e:2x2
jax: 0.10.0
libtpu: 0.0.40
codegen_flags: <defaults>
</compile_context>

<pallas_src>
import functools

import jax
import jax.numpy as jnp
from jax import lax
from jax.experimental import pallas as pl
from jax.experimental.pallas import tpu as pltpu


def _round_up(x, m):
    return ((x + m - 1) // m) * m


def _choose_tf(F, tf):
    """Largest divisor of F that is <= tf (never falls back to full F)."""
    t = max(1, min(tf, F))
    while F % t != 0:
        t -= 1
    return t


def _vmem_capacity_bytes():
    try:
        info = pltpu.get_tpu_info()
        cap = getattr(info, "vmem_capacity_bytes", None)
        if cap:
            return int(cap)
    except Exception:
        pass
    return 64 << 20  # conservative: v7x per-TC VMEM


def _default_tm():
    # 128 MiB VMEM (v5e/v6e): big token tile makes prefill MXU-bound.
    # 64 MiB (v7x): tm=256 is already near compute/DMA balance.
    return 768 if _vmem_capacity_bytes() >= (96 << 20) else 256


# --------------------------------------------------------------------------
# Gate kernel: router_logits = x @ Wg   (Wg pre-transposed to (H, E)),
# blocked over token tiles; fp32 logits straight to softmax.
# --------------------------------------------------------------------------
def _gate_kernel(x_ref, wg_ref, o_ref):
    o_ref[...] = jnp.dot(
        x_ref[...], wg_ref[...], preferred_element_type=jnp.float32)


def gate_logits(x, wg_t, *, tt):
    T, H = x.shape
    E = wg_t.shape[1]
    return pl.pallas_call(
        _gate_kernel,
        out_shape=jax.ShapeDtypeStruct((T, E), jnp.float32),
        grid=(T // tt,),
        in_specs=[
            pl.BlockSpec((tt, H), lambda i: (i, 0)),
            pl.BlockSpec((H, E), lambda i: (0, 0)),
        ],
        out_specs=pl.BlockSpec((tt, E), lambda i: (i, 0)),
        compiler_params=pltpu.CompilerParams(
            dimension_semantics=("parallel",)),
    )(x, wg_t)


# --------------------------------------------------------------------------
# MoE expert kernel.
# grid = (token_tiles, expert_slots, ffn_tiles); the expert & ffn axes are
# the (arbitrary) reduction axes; the (tm, H) output stays resident in a
# fp32 VMEM accumulator across them.  Expert slot e is remapped to the real
# expert id via the scalar-prefetched `ids` table; inactive slots repeat the
# last active id so their weight DMA is elided and compute is pl.when-skipped.
# --------------------------------------------------------------------------
def _moe_kernel(cnt_ref, ids_ref, x_ref, w13_ref, w2_ref, sc_ref, out_ref,
                acc_ref, *, tf, E):
    del ids_ref  # only used by the index_maps
    i = pl.program_id(0)
    e = pl.program_id(1)
    f = pl.program_id(2)

    @pl.when((e == 0) & (f == 0))
    def _():
        acc_ref[...] = jnp.zeros_like(acc_ref)

    @pl.when(cnt_ref[i * E + e] > 0)
    def _():
        x = x_ref[...]                                           # (tm, H)
        h = jnp.dot(x, w13_ref[0],
                    preferred_element_type=jnp.float32)          # (tm, 2*tf)
        h1 = h[:, :tf]
        h3 = h[:, tf:]
        g = (h1 * jax.nn.sigmoid(h1)) * h3                       # silu(h1)*h3
        # Fold the per-token routing weight into g (tm, tf) instead of the
        # (tm, H) output; sc_ref is the (1, tm, 1) remapped routing slab.
        g = g * sc_ref[0].astype(jnp.float32)
        acc_ref[...] += jnp.dot(g.astype(x.dtype), w2_ref[0],
                                preferred_element_type=jnp.float32)

    @pl.when((e == pl.num_programs(1) - 1) & (f == pl.num_programs(2) - 1))
    def _():
        out_ref[...] = acc_ref[...].astype(out_ref.dtype)


def moe_experts(x, w13, w2_t, ew_t, cnt_flat, ids_flat, *, tm, tf):
    T, H = x.shape
    E, _, F2 = w13.shape
    F = F2 // 2
    nf = F // tf
    tf2 = 2 * tf

    # VMEM budget: double-buffered blocks + fp32 accumulator + fp32 h/g
    # intermediates, clamped to 85% of this generation's physical VMEM.
    itm = jnp.dtype(x.dtype).itemsize
    itw = jnp.dtype(w13.dtype).itemsize
    block_bytes = (tm * H * itm          # x tile
                   + H * tf2 * itw       # fused w1/w3 tile
                   + tf * H * itw        # w2 tile
                   + tm * itm            # routing-scale slab
                   + tm * H * itm)       # out tile
    acc_bytes = tm * H * 4
    inter_bytes = (tm * tf2 + 2 * tm * tf) * 4   # h, h1/h3/g scratch
    vmem_cap = _vmem_capacity_bytes()
    vmem_limit = 2 * block_bytes + acc_bytes + inter_bytes + (4 << 20)
    vmem_limit = int(min(max(vmem_limit, 32 << 20), int(0.85 * vmem_cap)))

    return pl.pallas_call(
        functools.partial(_moe_kernel, tf=tf, E=E),
        out_shape=jax.ShapeDtypeStruct((T, H), x.dtype),
        grid_spec=pltpu.PrefetchScalarGridSpec(
            num_scalar_prefetch=2,
            grid=(T // tm, E, nf),
            in_specs=[
                # x token tile
                pl.BlockSpec((tm, H), lambda i, e, f, cnt, ids: (i, 0)),
                # fused w1/w3 slab, remapped to the active expert id
                pl.BlockSpec((1, H, tf2),
                             lambda i, e, f, cnt, ids: (ids[i * E + e], 0, f)),
                # w2 slab, remapped
                pl.BlockSpec((1, tf, H),
                             lambda i, e, f, cnt, ids: (ids[i * E + e], f, 0)),
                # routing-scale slab (E, T_pad, 1), remapped
                pl.BlockSpec((1, tm, 1),
                             lambda i, e, f, cnt, ids: (ids[i * E + e], i, 0)),
            ],
            out_specs=pl.BlockSpec((tm, H), lambda i, e, f, cnt, ids: (i, 0)),
            scratch_shapes=[pltpu.VMEM((tm, H), jnp.float32)],
        ),
        compiler_params=pltpu.CompilerParams(
            dimension_semantics=("parallel", "arbitrary", "arbitrary"),
            vmem_limit_bytes=vmem_limit,
        ),
    )(cnt_flat, ids_flat, x, w13, w2_t, ew_t)


# --------------------------------------------------------------------------
# One-time host-side weight layout prep (no in-kernel transposes).
#   gate_w: (E, H)     -> wg_t: (H, E)
#   w1, w3: (E, F, H)  -> fused w13: (E, H, 2F), interleaved per ffn tile so
#                         column block f of width 2*tf is [w1_tile_f|w3_tile_f]
#   w2:     (E, H, F)  -> w2_t: (E, F, H)
# Returns the interleave tile tf_eff; it MUST be passed to moe_block_forward.
# --------------------------------------------------------------------------
def prepare_moe_weights(gate_w, w1, w3, w2, *, tf=512):
    E, F, H = w1.shape
    tf_eff = _choose_tf(F, tf)
    nf = F // tf_eff
    w1_t = jnp.transpose(w1, (0, 2, 1))          # (E, H, F)
    w3_t = jnp.transpose(w3, (0, 2, 1))          # (E, H, F)
    w13 = jnp.concatenate(
        [w1_t.reshape(E, H, nf, tf_eff), w3_t.reshape(E, H, nf, tf_eff)],
        axis=-1).reshape(E, H, 2 * F)
    w2_t = jnp.transpose(w2, (0, 2, 1))          # (E, F, H)
    wg_t = jnp.transpose(gate_w, (1, 0))         # (H, E)
    return wg_t, w13, w2_t, tf_eff


# --------------------------------------------------------------------------
# Full MoE block forward (gate kernel + softmax/top-k glue + expert kernel)
# --------------------------------------------------------------------------
@functools.partial(jax.jit, static_argnames=("top_k", "tm", "tf"))
def _moe_block_forward_impl(hidden_states, wg_t, w13, w2_t, *, top_k, tm, tf):
    B, S, H = hidden_states.shape
    E = wg_t.shape[1]
    F = w13.shape[2] // 2
    assert F % tf == 0, "tf must match the interleave tile from prepare_moe_weights"

    x = hidden_states.reshape(-1, H)                      # (T, H)
    T = x.shape[0]
    tm_eff = min(tm, _round_up(T, 16))                    # >=16 rows
    # Megacore guard (v7x has 2 TCs): guarantee >= 2 token tiles for the
    # "parallel" grid axis when there is enough work.
    if T >= 256 and _round_up(T, tm_eff) == tm_eff:
        tm_eff = max(128, _round_up(tm_eff // 2, 16))
    T_pad = _round_up(T, tm_eff)
    n_tiles = T_pad // tm_eff
    x_pad = jnp.pad(x, ((0, T_pad - T), (0, 0))) if T_pad != T else x

    # --- gate + routing (softmax/top_k glue left to XLA: trivial ops) ---
    router_logits = gate_logits(x_pad, wg_t, tt=tm_eff)[:T]   # fp32 (T, E)
    probs = jax.nn.softmax(router_logits, axis=-1)
    rw, sel = lax.top_k(probs, top_k)
    rw = rw / jnp.sum(rw, axis=-1, keepdims=True)
    rw = rw.astype(x.dtype)

    # Dense (T, E) routing matrix (zero where an expert is not selected).
    one_hot = jax.nn.one_hot(sel, E, dtype=x.dtype)       # (T, k, E)
    ew = jnp.sum(rw[:, :, None] * one_hot, axis=1)        # (T, E)
    ew_pad = jnp.pad(ew, ((0, T_pad - T), (0, 0))) if T_pad != T else ew

    # Per-(token-tile, expert) routed-token counts and the sorted
    # active-expert-id table (inactive slots repeat the last active id so
    # their weight DMA is elided; cnt==0 skips compute).
    counts = (ew_pad.reshape(n_tiles, tm_eff, E) != 0).sum(
        axis=1).astype(jnp.int32)                         # (n_tiles, E)
    active = counts > 0
    eidx = jnp.arange(E, dtype=jnp.int32)
    sort_key = jnp.where(active, eidx[None, :], eidx[None, :] + E)
    perm = jnp.argsort(sort_key, axis=1).astype(jnp.int32)  # active ids first
    cnt_sorted = jnp.take_along_axis(counts, perm, axis=1)
    n_active = active.sum(axis=1).astype(jnp.int32)          # (n_tiles,)
    last_id = jnp.take_along_axis(
        perm, jnp.maximum(n_active - 1, 0)[:, None], axis=1)  # (n_tiles, 1)
    slot = eidx[None, :]
    ids_final = jnp.where(slot < n_active[:, None], perm, last_id)
    cnt_final = jnp.where(slot < n_active[:, None], cnt_sorted, 0)
    ids_flat = ids_final.reshape(-1).astype(jnp.int32)     # 1D SMEM-friendly
    cnt_flat = cnt_final.reshape(-1).astype(jnp.int32)

    # Routing scale laid out as (E, T_pad, 1) -> kernel reads a (tm, 1) slab.
    ew_t = jnp.transpose(ew_pad, (1, 0))[:, :, None]

    out_pad = moe_experts(x_pad, w13, w2_t, ew_t, cnt_flat, ids_flat,
                          tm=tm_eff, tf=tf)               # (T_pad, H)
    out = out_pad[:T]
    return out.reshape(B, S, H), router_logits


def moe_block_forward(hidden_states, wg_t, w13, w2_t, tf, *, top_k=2,
                      tm=None):
    if tm is None:
        tm = _default_tm()                 # generation-aware token tile
    return _moe_block_forward_impl(hidden_states, wg_t, w13, w2_t,
                                   top_k=top_k, tm=tm, tf=tf)


# --------------------------------------------------------------------------
# Pure-JAX reference (original PyTorch weight layouts) for correctness check
# --------------------------------------------------------------------------
def moe_block_reference(hidden_states, gate_w, w1, w3, w2, top_k=2):
    B, S, H = hidden_states.shape
    E = gate_w.shape[0]
    x = hidden_states.reshape(-1, H)
    logits = x @ gate_w.T
    probs = jax.nn.softmax(logits.astype(jnp.float32), axis=-1)
    rw, sel = lax.top_k(probs, top_k)
    rw = rw / jnp.sum(rw, axis=-1, keepdims=True)
    rw = rw.astype(x.dtype)
    one_hot = jax.nn.one_hot(sel, E, dtype=x.dtype)
    ewm = jnp.sum(rw[:, :, None] * one_hot, axis=1)       # (T, E)
    out = jnp.zeros_like(x)
    for e in range(E):
        h1 = x @ w1[e].T
        h3 = x @ w3[e].T
        g = (h1 * jax.nn.sigmoid(h1)) * h3
        y = g @ w2[e].T
        out = out + ewm[:, e:e + 1] * y
    return out.reshape(B, S, H), logits


if __name__ == "__main__":
    # Small Mixtral-like config.
    batch, seq = 2, 8
    hidden_dim, ffn_dim = 32, 64
    num_experts, top_k = 8, 2

    key = jax.random.PRNGKey(0)
    k_x, k_g, k_w1, k_w3, k_w2 = jax.random.split(key, 5)

    hidden_states = jax.random.normal(
        k_x, (batch, seq, hidden_dim), dtype=jnp.float32)
    gate_w = 0.1 * jax.random.normal(
        k_g, (num_experts, hidden_dim), dtype=jnp.float32)
    w1 = 0.1 * jax.random.normal(
        k_w1, (num_experts, ffn_dim, hidden_dim), dtype=jnp.float32)
    w3 = 0.1 * jax.random.normal(
        k_w3, (num_experts, ffn_dim, hidden_dim), dtype=jnp.float32)
    w2 = 0.1 * jax.random.normal(
        k_w2, (num_experts, hidden_dim, ffn_dim), dtype=jnp.float32)

    # One-time host-side weight layout prep (returns the interleave tile).
    wg_t, w13, w2_t, tf_eff = prepare_moe_weights(gate_w, w1, w3, w2, tf=512)

    out, logits = moe_block_forward(
        hidden_states, wg_t, w13, w2_t, tf_eff, top_k=top_k)
    out = jax.block_until_ready(out)
    logits = jax.block_until_ready(logits)

    ref_out, ref_logits = moe_block_reference(
        hidden_states, gate_w, w1, w3, w2, top_k=top_k)
    assert out.shape == (batch, seq, hidden_dim)
    assert logits.shape == (batch * seq, num_experts)
    assert jnp.allclose(out, ref_out, atol=1e-3, rtol=1e-3), (
        float(jnp.max(jnp.abs(out - ref_out))))
    assert jnp.allclose(logits, ref_logits, atol=1e-3, rtol=1e-3)

    print("KERNEL_OK")
</pallas_src>

<mosaic_0001>
module attributes {stable_mosaic.version = 11 : i64} {
  func.func @_gate_kernel(%arg0: i32, %arg1: memref<16x32xf32, #tpu.memory_space<vmem>>, %arg2: memref<32x8xf32, #tpu.memory_space<vmem>>, %arg3: memref<16x8xf32, #tpu.memory_space<vmem>>) attributes {dimension_semantics = [#tpu.dimension_semantics<parallel>], iteration_bounds = array<i64: 1>, scalar_prefetch = 0 : i64, scratch_operands = 0 : i64, tpu.core_type = #tpu.core_type<tc>, window_params = [{transform_indices = @transform_0, window_bounds = array<i64: 16, 32>}, {pipeline_mode = #tpu.pipeline_mode<synchronous>, transform_indices = @transform_1, window_bounds = array<i64: 32, 8>}, {transform_indices = @transform_2, window_bounds = array<i64: 16, 8>}]} {
    %c0 = arith.constant 0 : index
    %c0_0 = arith.constant 0 : index
    %0 = vector.load %arg1[%c0, %c0_0] : memref<16x32xf32, #tpu.memory_space<vmem>>, vector<16x32xf32>
    %c0_1 = arith.constant 0 : index
    %c0_2 = arith.constant 0 : index
    %1 = vector.load %arg2[%c0_1, %c0_2] : memref<32x8xf32, #tpu.memory_space<vmem>>, vector<32x8xf32>
    %cst = arith.constant dense<0.000000e+00> : vector<16x8xf32>
    %2 = tpu.matmul %0, %1, %cst {dimension_numbers = #tpu.dot_dimension_numbers<[1], [0], [0], [1], [0, 0, 1, 1], [], []>} : vector<16x32xf32>, vector<32x8xf32>, vector<16x8xf32> -> vector<16x8xf32>
    %c0_3 = arith.constant 0 : index
    %c0_4 = arith.constant 0 : index
    %3 = vector.load %arg3[%c0_3, %c0_4] : memref<16x8xf32, #tpu.memory_space<vmem>>, vector<16x8xf32>
    tpu.vector_store %arg3[%c0_3, %c0_4], %2 {strides = array<i32>} : memref<16x8xf32, #tpu.memory_space<vmem>>, vector<16x8xf32>,
    return
  }
  func.func @transform_0(%arg0: i32) -> (i32, i32) {
    %c0_i32 = arith.constant 0 : i32
    %c0_i32_0 = arith.constant 0 : i32
    return %arg0, %c0_i32 : i32, i32
  }
  func.func @transform_1(%arg0: i32) -> (i32, i32) {
    %c0_i32 = arith.constant 0 : i32
    %c0_i32_0 = arith.constant 0 : i32
    %c0_i32_1 = arith.constant 0 : i32
    return %c0_i32, %c0_i32_0 : i32, i32
  }
  func.func @transform_2(%arg0: i32) -> (i32, i32) {
    %c0_i32 = arith.constant 0 : i32
    %c0_i32_0 = arith.constant 0 : i32
    return %arg0, %c0_i32 : i32, i32
  }
}

module attributes {stable_mosaic.version = 11 : i64} {
  func.func @_moe_kernel(%arg0: i32, %arg1: i32, %arg2: i32, %arg3: memref<8xi32, #tpu.memory_space<smem>>, %arg4: memref<8xi32, #tpu.memory_space<smem>>, %arg5: memref<16x32xf32, #tpu.memory_space<vmem>>, %arg6: memref<1x32x128xf32, #tpu.memory_space<vmem>>, %arg7: memref<1x64x32xf32, #tpu.memory_space<vmem>>, %arg8: memref<1x16x1xf32, #tpu.memory_space<vmem>>, %arg9: memref<16x32xf32, #tpu.memory_space<vmem>>, %arg10: memref<16x32xf32, #tpu.memory_space<vmem>>) attributes {dimension_semantics = [#tpu.dimension_semantics<parallel>, #tpu.dimension_semantics<arbitrary>, #tpu.dimension_semantics<arbitrary>], iteration_bounds = array<i64: 1, 8, 1>, scalar_prefetch = 2 : i64, scratch_operands = 1 : i64, tpu.core_type = #tpu.core_type<tc>, window_params = [{transform_indices = @transform_0, window_bounds = array<i64: 16, 32>}, {transform_indices = @transform_1, window_bounds = array<i64: 1, 32, 128>}, {transform_indices = @transform_2, window_bounds = array<i64: 1, 64, 32>}, {transform_indices = @transform_3, window_bounds = array<i64: 1, 16, 1>}, {transform_indices = @transform_4, window_bounds = array<i64: 16, 32>}]} {
    %c0_i32 = arith.constant 0 : i32
    %0 = arith.cmpi eq, %arg1, %c0_i32 : i32
    %c0_i32_0 = arith.constant 0 : i32
    %1 = arith.cmpi eq, %arg2, %c0_i32_0 : i32
    %2 = arith.andi %0, %1 : i1
    %3 = arith.extui %2 : i1 to i32
    %c0_i32_1 = arith.constant 0 : i32
    %4 = arith.cmpi ne, %3, %c0_i32_1 : i32
    scf.if %4 {
      %cst = arith.constant 0.000000e+00 : f32
      %17 = vector.broadcast %cst : f32 to vector<16x32xf32>
      %c0 = arith.constant 0 : index
      %c0_6 = arith.constant 0 : index
      %18 = vector.load %arg10[%c0, %c0_6] : memref<16x32xf32, #tpu.memory_space<vmem>>, vector<16x32xf32>
      tpu.vector_store %arg10[%c0, %c0_6], %17 {strides = array<i32>} : memref<16x32xf32, #tpu.memory_space<vmem>>, vector<16x32xf32>,
    } else {
    }
    %c8_i32 = arith.constant 8 : i32
    %5 = arith.muli %arg0, %c8_i32 : i32
    %6 = arith.addi %5, %arg1 : i32
    %7 = arith.index_cast %6 : i32 to index
    %8 = memref.load %arg3[%7] : memref<8xi32, #tpu.memory_space<smem>>
    %c0_i32_2 = arith.constant 0 : i32
    %9 = arith.cmpi sgt, %8, %c0_i32_2 : i32
    %10 = arith.extui %9 : i1 to i32
    %c0_i32_3 = arith.constant 0 : i32
    %11 = arith.cmpi ne, %10, %c0_i32_3 : i32
    scf.if %11 {
      %c0 = arith.constant 0 : index
      %c0_6 = arith.constant 0 : index
      %17 = vector.load %arg5[%c0, %c0_6] : memref<16x32xf32, #tpu.memory_space<vmem>>, vector<16x32xf32>
      %c0_7 = arith.constant 0 : index
      %c0_8 = arith.constant 0 : index
      %c0_9 = arith.constant 0 : index
      %18 = vector.load %arg6[%c0_7, %c0_8, %c0_9] : memref<1x32x128xf32, #tpu.memory_space<vmem>>, vector<1x32x128xf32>
      %19 = vector.shape_cast %18 : vector<1x32x128xf32> to vector<32x128xf32>
      %cst = arith.constant dense<0.000000e+00> : vector<16x128xf32>
      %20 = tpu.matmul %17, %19, %cst {dimension_numbers = #tpu.dot_dimension_numbers<[1], [0], [0], [1], [0, 0, 1, 1], [], []>} : vector<16x32xf32>, vector<32x128xf32>, vector<16x128xf32> -> vector<16x128xf32>
      %21 = vector.extract_strided_slice %20 {offsets = [0, 0], sizes = [16, 64], strides = [1, 1]} : vector<16x128xf32> to vector<16x64xf32>
      %22 = vector.extract_strided_slice %20 {offsets = [0, 64], sizes = [16, 64], strides = [1, 1]} : vector<16x128xf32> to vector<16x64xf32>
      %23 = arith.negf %21 : vector<16x64xf32>
      %24 = math.exp %23 : vector<16x64xf32>
      %cst_10 = arith.constant 1.000000e+00 : f32
      %25 = vector.broadcast %cst_10 : f32 to vector<16x64xf32>
      %26 = arith.addf %25, %24 : vector<16x64xf32>
      %27 = arith.divf %25, %26 : vector<16x64xf32>
      %28 = arith.mulf %21, %27 : vector<16x64xf32>
      %29 = arith.mulf %28, %22 : vector<16x64xf32>
      %c0_11 = arith.constant 0 : index
      %c0_12 = arith.constant 0 : index
      %c0_13 = arith.constant 0 : index
      %30 = vector.load %arg8[%c0_11, %c0_12, %c0_13] : memref<1x16x1xf32, #tpu.memory_space<vmem>>, vector<1x16x1xf32>
      %31 = vector.shape_cast %30 : vector<1x16x1xf32> to vector<16x1xf32>
      %32 = vector.broadcast %31 : vector<16x1xf32> to vector<16x64xf32>
      %33 = arith.mulf %29, %32 : vector<16x64xf32>
      %c0_14 = arith.constant 0 : index
      %c0_15 = arith.constant 0 : index
      %34 = vector.load %arg10[%c0_14, %c0_15] : memref<16x32xf32, #tpu.memory_space<vmem>>, vector<16x32xf32>
      %c0_16 = arith.constant 0 : index
      %c0_17 = arith.constant 0 : index
      %c0_18 = arith.constant 0 : index
      %35 = vector.load %arg7[%c0_16, %c0_17, %c0_18] : memref<1x64x32xf32, #tpu.memory_space<vmem>>, vector<1x64x32xf32>
      %36 = vector.shape_cast %35 : vector<1x64x32xf32> to vector<64x32xf32>
      %cst_19 = arith.constant dense<0.000000e+00> : vector<16x32xf32>
      %37 = tpu.matmul %33, %36, %cst_19 {dimension_numbers = #tpu.dot_dimension_numbers<[1], [0], [0], [1], [0, 0, 1, 1], [], []>} : vector<16x64xf32>, vector<64x32xf32>, vector<16x32xf32> -> vector<16x32xf32>
      %38 = arith.addf %34, %37 : vector<16x32xf32>
      %c0_20 = arith.constant 0 : index
      %c0_21 = arith.constant 0 : index
      %39 = vector.load %arg10[%c0_20, %c0_21] : memref<16x32xf32, #tpu.memory_space<vmem>>, vector<16x32xf32>
      tpu.vector_store %arg10[%c0_20, %c0_21], %38 {strides = array<i32>} : memref<16x32xf32, #tpu.memory_space<vmem>>, vector<16x32xf32>,
    } else {
    }
    %c7_i32 = arith.constant 7 : i32
    %12 = arith.cmpi eq, %arg1, %c7_i32 : i32
    %c0_i32_4 = arith.constant 0 : i32
    %13 = arith.cmpi eq, %arg2, %c0_i32_4 : i32
    %14 = arith.andi %12, %13 : i1
    %15 = arith.extui %14 : i1 to i32
    %c0_i32_5 = arith.constant 0 : i32
    %16 = arith.cmpi ne, %15, %c0_i32_5 : i32
    scf.if %16 {
      %c0 = arith.constant 0 : index
      %c0_6 = arith.constant 0 : index
      %17 = vector.load %arg10[%c0, %c0_6] : memref<16x32xf32, #tpu.memory_space<vmem>>, vector<16x32xf32>
      %c0_7 = arith.constant 0 : index
      %c0_8 = arith.constant 0 : index
      %18 = vector.load %arg9[%c0_7, %c0_8] : memref<16x32xf32, #tpu.memory_space<vmem>>, vector<16x32xf32>
      tpu.vector_store %arg9[%c0_7, %c0_8], %17 {strides = array<i32>} : memref<16x32xf32, #tpu.memory_space<vmem>>, vector<16x32xf32>,
    } else {
    }
    return
  }
  func.func @transform_0(%arg0: i32, %arg1: i32, %arg2: i32, %arg3: memref<8xi32, #tpu.memory_space<smem>>, %arg4: memref<8xi32, #tpu.memory_space<smem>>) -> (i32, i32) {
    %c0_i32 = arith.constant 0 : i32
    %c0_i32_0 = arith.constant 0 : i32
    return %arg0, %c0_i32 : i32, i32
  }
  func.func @transform_1(%arg0: i32, %arg1: i32, %arg2: i32, %arg3: memref<8xi32, #tpu.memory_space<smem>>, %arg4: memref<8xi32, #tpu.memory_space<smem>>) -> (i32, i32, i32) {
    %c8_i32 = arith.constant 8 : i32
    %0 = arith.muli %arg0, %c8_i32 : i32
    %1 = arith.addi %0, %arg1 : i32
    %2 = arith.index_cast %1 : i32 to index
    %3 = memref.load %arg4[%2] : memref<8xi32, #tpu.memory_space<smem>>
    %c0_i32 = arith.constant 0 : i32
    %c0_i32_0 = arith.constant 0 : i32
    return %3, %c0_i32, %arg2 : i32, i32, i32
  }
  func.func @transform_2(%arg0: i32, %arg1: i32, %arg2: i32, %arg3: memref<8xi32, #tpu.memory_space<smem>>, %arg4: memref<8xi32, #tpu.memory_space<smem>>) -> (i32, i32, i32) {
    %c8_i32 = arith.constant 8 : i32
    %0 = arith.muli %arg0, %c8_i32 : i32
    %1 = arith.addi %0, %arg1 : i32
    %2 = arith.index_cast %1 : i32 to index
    %3 = memref.load %arg4[%2] : memref<8xi32, #tpu.memory_space<smem>>
    %c0_i32 = arith.constant 0 : i32
    %c0_i32_0 = arith.constant 0 : i32
    return %3, %arg2, %c0_i32 : i32, i32, i32
  }
  func.func @transform_3(%arg0: i32, %arg1: i32, %arg2: i32, %arg3: memref<8xi32, #tpu.memory_space<smem>>, %arg4: memref<8xi32, #tpu.memory_space<smem>>) -> (i32, i32, i32) {
    %c8_i32 = arith.constant 8 : i32
    %0 = arith.muli %arg0, %c8_i32 : i32
    %1 = arith.addi %0, %arg1 : i32
    %2 = arith.index_cast %1 : i32 to index
    %3 = memref.load %arg4[%2] : memref<8xi32, #tpu.memory_space<smem>>
    %c0_i32 = arith.constant 0 : i32
    %c0_i32_0 = arith.constant 0 : i32
    return %3, %arg0, %c0_i32 : i32, i32, i32
  }
  func.func @transform_4(%arg0: i32, %arg1: i32, %arg2: i32, %arg3: memref<8xi32, #tpu.memory_space<smem>>, %arg4: memref<8xi32, #tpu.memory_space<smem>>) -> (i32, i32) {
    %c0_i32 = arith.constant 0 : i32
    %c0_i32_0 = arith.constant 0 : i32
    return %arg0, %c0_i32 : i32, i32
  }
}

</mosaic_0001>

<bundles_post_ra>
// kernel: _moe_block_forward_impl.2
= control target key start
LH: loop header
LB: loop body
LE: loop exit
PB: predicated region body
PF: predicated region fallthrough
CT: control target
= control target key end

     0   :  { %vm17_vm0 = vcmask 261120   ;;  %vm47_vm1 = vcmask 64512   ;;  %s99_s1 = inlined_call_operand.vmem [shape: f32[32,8], index: 1, kind: input, shape index: {}]   ;;  %s100_s0 = inlined_call_operand.vmem [shape: f32[16,32], index: 0, kind: input, shape index: {}]   ;;  %s101_s2 = inlined_call_operand.vmem [shape: f32[16,8], index: 2, kind: output, shape index: {}]  }
   0x1   :  { %v16_v0 = vld [vmem:[%s99_s1 + $0x18] sm:$0xff]  ;;  %v15_v1 = vld [vmem:[%s99_s1 + $0x10] sm:$0xff]  ;;  %v14_v2 = vld [vmem:[%s99_s1 + $0x8] sm:$0xff] }
   0x2   :  { %36 = vmatpush.msra.mxu0 %v16_v0  ;;  %56 = vmatpush.msra.mxu1 %v16_v0  ;;  %v13_v3 = vld [vmem:[%s99_s1] sm:$0xff]  ;;  %v12_v5 = vld [vmem:[%s100_s0 + $0x8] sm:$0xff] }
   0x3   :  { %v11_v4 = vld [vmem:[%s100_s0] sm:$0xff] }
   0x4   :  { %37 = vmatpush.msra.mxu0 %v15_v1  ;;  %57 = vmatpush.msra.mxu1 %v15_v1 }
   0x6   :  { %38 = vmatpush.msra.mxu0 %v14_v2  ;;  %58 = vmatpush.msra.mxu1 %v14_v2 }
   0x8   :  { %39 = vmatpush.msra.mxu0 %v13_v3  ;;  %59 = vmatpush.msra.mxu1 %v13_v3 }
   0x9   :  { %54 = vmatmul.msk.f32.vlgmr.msra.gmra.mxu0 %vm17_vm0, %v11_v4  ;;  %55 = vmatmul.msk.f32.vlgmr.msra.gmra.mxu1 %vm17_vm0, %v12_v5 }
  0x86   :  { %v41_v6 = vpop.f32.mrf.mxu0  ;;  %v44_v7 = vpop.f32.mrf.mxu1 }
  0x87   :  { %48 = vst.msk [vmem:[%s101_s2] sm:$0xff] %vm47_vm1, %v41_v6 }
  0x88   :  { %49 = vst.msk [vmem:[%s101_s2 + $0x8] sm:$0xff] %vm47_vm1, %v44_v7 }

// kernel: _moe_block_forward_impl.3
= control target key start
LH: loop header
LB: loop body
LE: loop exit
PB: predicated region body
PF: predicated region fallthrough
CT: control target
= control target key end

     0   :  { %s857_s27 = smov [#allocation4]   ;;  %s858_s28 = smov [#allocation5]   ;;  %s992_s0 = inlined_call_operand.vmem [shape: s32[8], index: 0, kind: input, shape index: {}]   ;;  %s993_s2 = inlined_call_operand.vmem [shape: f32[16,32], index: 2, kind: input, shape index: {}]   ;;  %s994_s3 = inlined_call_operand.vmem [shape: f32[8,32,128], index: 3, kind: input, shape index: {}]   ;;  %s995_s4 = inlined_call_operand.vmem [shape: f32[8,64,32], index: 4, kind: input, shape index: {}]   ;;  %s996_s5 = inlined_call_operand.vmem [shape: f32[8,16,1], index: 5, kind: input, shape index: {}]   ;;  %s997_s6 = inlined_call_operand.hbm [shape: f32[16,32], index: 6, kind: output, shape index: {}]   ;;  %s998_s1 = inlined_call_operand.vmem [shape: s32[8], index: 1, kind: input, shape index: {}]  }
   0x1   :  { %s12_s23 = sshll.u32 %s992_s0, 4  ;;  %s17_s26 = sshll.u32 %s998_s1, 4  ;;  %s13_s23 = int_to_ptr.vmem [resolvable:$true] %s12_s23  ;;  %s18_s26 = int_to_ptr.vmem [resolvable:$true] %s17_s26 }
   0x2   :  { %15 = dma.vmem_to_smem %s13_s23, 16, %s857_s27, [#allocation3] }
   0x3   :  { %20 = dma.vmem_to_smem %s18_s26, 16, %s858_s28, [#allocation3] }
   0x4   :  { %839 = dma.done.wait [#allocation3], 32 }
   0x5   :  { %840 = vsyncadd [#allocation3], 4294967264 }
   0x6   :  { %23 = sfence }
   0x7   :  { %24 = vsyncpa [#allocation7], 0  ;;  %s906_s29 = smov 0   ;;  %s908_s30 = smov 0  }
   0x8   :  { %s910_s7 = smov 0  }
   0x9 LB: > { %s686_s0 = sadd.s32 4294967295, %s855_s7   ;;  %s45_s1 = sadd.s32 1, %s851_s30  ;;  %s855_s7 = sphi %s910_s7, %s30_s7   ;;  %s851_s30 = sphi %s908_s30, %s1000_s30   ;;  %s847_s29 = sphi %s906_s29, %s999_s29  }
   0xa   : > { %p47_p0 = scmp.ge.s32.totalorder %s45_s1, 8  ;;  %p690_p1 = scmp.ge.s32.totalorder %s855_s7, 1 }
   0xb   : > { %p283_p2 = scmp.lt.s32.totalorder %s855_s7, 9 }
   0xc   : > { %s1002_s1 = smov (%p47_p0, %s45_s1), 0 }
   0xd   : > { %p284_p3 = pnand %p690_p1, %p283_p2 }
   0xe   : > { %s347_s8 = sld [smem:[#allocation5 + %s847_s29]] (!%p284_p3)  ;;  %p392_p4 = scmp.eq.s32.totalorder (!%p284_p3), %s847_s29, 0 }
   0xf   : > { %287 = sbr.rel (%p284_p3) target bundleno = 458 (0x1ca), region = 36  ;;  %s361_s9 = sld [smem:[#allocation5 + %s847_s29]] (!%p284_p3) }
  0x10   : > { %s377_s10 = sld [smem:[#allocation5 + %s847_s29]] (!%p284_p3) }
  0x14   : > { %p348_p5 = scmp.lt.s32.totalorder %s347_s8, 7  ;;  %vm398_vm0 = vcmask (%p392_p4), 261120   ;;  %v859_v0 = vmov (%p392_p4), 0.0  }
  0x15   : > { %p363_p6 = scmp.lt.s32.totalorder %s361_s9, 7  ;;  %399 = vst.msk [vmem:[#allocation2] sm:$0xff] (%p392_p4), %vm398_vm0, %v859_v0 }
  0x16   : > { %s1004_s8 = smov (!%p348_p5, %s347_s8), 7  ;;  %p379_p7 = scmp.lt.s32.totalorder %s377_s10, 7  ;;  %400 = vst.msk [vmem:[#allocation2 + $0x8] sm:$0xff] (%p392_p4), %vm398_vm0, %v859_v0 }
  0x17   : > { %s1006_s9 = smov (!%p363_p6, %s361_s9), 7  ;;  %s710_s11 = sshll.u32 %s1004_s8, 5 }
  0x18   : > { %s355_s14 = scalar_lea.vmem %s994_s3, %s710_s11  ;;  %s711_s15 = sshll.u32 %s1006_s9, 6 }
  0x19   : > { %s937_s18 = scalar_lea.vmem %s995_s4, %s711_s15  ;;  %s1008_s10 = smov (!%p379_p7, %s377_s10), 7 }
  0x1a   : > { %s712_s19 = sshll.u32 %s1008_s10, 4  ;;  %397 = sbr.rel (!%p392_p4) target bundleno = 31 (0x1f), region = 40 }
  0x1b   : > { %s942_s22 = scalar_lea.vmem %s996_s5, %s712_s19 }
  0x1f PF: > { %s403_s23 = sld [smem:[#allocation4 + %s847_s29]] }
  0x25   : > { %p698_p8 = scmp.le.s32.totalorder %s403_s23, 0 }
  0x26   : > { %s861_s28 = smov (!%p698_p8), 64  }
  0x27   : > { %407 = sbr.rel (%p698_p8) target bundleno = 444 (0x1bc), region = 44 }
  0x2c   : > { %v413_v1 = vld [vmem:[%s355_s14 + $0x18] sm:$0xff]  ;;  %v412_v2 = vld [vmem:[%s355_s14 + $0x10] sm:$0xff]  ;;  %v411_v3 = vld [vmem:[%s355_s14 + $0x8] sm:$0xff]  ;;  %vm414_vm1 = vcmask 261120   ;;  %v860_v7 = vmov 0   ;;  %vm518_vm10 = vcmask 523264  }
  0x2d   : > { %433 = vmatpush.msra.mxu0 %v413_v1  ;;  %715 = vmatpush.msra.mxu3 %v413_v1  ;;  %v410_v4 = vld [vmem:[%s355_s14] sm:$0xff]  ;;  %v409_v6 = vld [vmem:[%s993_s2 + $0x8] sm:$0xff]  ;;  %v517_v9 = vld [vmem:[%s937_s18 + $0x38] sm:$0xff] }
  0x2e   : > { %v408_v5 = vld [vmem:[%s993_s2] sm:$0xff]  ;;  %766 = vset.pattern.permute.xlu1 %v860_v7  ;;  %765 = vset.pattern.permute.xlu0 %v860_v7  ;;  %v516_v10 = vld [vmem:[%s937_s18 + $0x30] sm:$0xff]  ;;  %v515_v11 = vld [vmem:[%s937_s18 + $0x28] sm:$0xff] }
  0x2f   : > { %434 = vmatpush.msra.mxu0 %v412_v2  ;;  %716 = vmatpush.msra.mxu3 %v412_v2  ;;  %v494_v13 = vld [vmem:[%s942_s22] sm:$0xff]  ;;  %v495_v14 = vld [vmem:[%s942_s22 + $0x8] sm:$0xff]  ;;  %v513_v19 = vld [vmem:[%s937_s18 + $0x18] sm:$0xff] }
  0x30   : > { %533 = vmatpush.msra.mxu1 %v517_v9  ;;  %719 = vmatpush.msra.mxu2 %v517_v9  ;;  %v514_v18 = vld [vmem:[%s937_s18 + $0x20] sm:$0xff]  ;;  %v512_v21 = vld [vmem:[%s937_s18 + $0x10] sm:$0xff]  ;;  %v511_v23 = vld [vmem:[%s937_s18 + $0x8] sm:$0xff] }
  0x31   : > { %435 = vmatpush.msra.mxu0 %v411_v3  ;;  %717 = vmatpush.msra.mxu3 %v411_v3  ;;  %v510_v25 = vld [vmem:[%s937_s18] sm:$0xff]  ;;  %v509_v59 = vld [vmem:[#allocation2 + $0x8] sm:$0xff] }
  0x32   : > { %534 = vmatpush.msra.mxu1 %v516_v10  ;;  %720 = vmatpush.msra.mxu2 %v516_v10  ;;  %v508_v56 = vld [vmem:[#allocation2] sm:$0xff] }
  0x33   : > { %436 = vmatpush.msra.mxu0 %v410_v4  ;;  %718 = vmatpush.msra.mxu3 %v410_v4 }
  0x34   : > { %699 = vmatmul.msk.f32.vlgmr.msra.gmra.mxu0 %vm414_vm1, %v408_v5  ;;  %700 = vmatmul.msk.f32.vlgmr.msra.gmra.mxu3 %vm414_vm1, %v409_v6 }
  0x35   : > { %535 = vmatpush.msra.mxu1 %v515_v11  ;;  %721 = vmatpush.msra.mxu2 %v515_v11 }
  0x37   : > { %536 = vmatpush.msra.mxu1 %v514_v18  ;;  %722 = vmatpush.msra.mxu2 %v514_v18 }
  0x39   : > { %537 = vmatpush.msra.mxu1 %v513_v19  ;;  %723 = vmatpush.msra.mxu2 %v513_v19 }
  0x3b   : > { %538 = vmatpush.msra.mxu1 %v512_v21  ;;  %724 = vmatpush.msra.mxu2 %v512_v21 }
  0x3d   : > { %539 = vmatpush.msra.mxu1 %v511_v23  ;;  %725 = vmatpush.msra.mxu2 %v511_v23 }
  0x3f   : > { %540 = vmatpush.msra.mxu1 %v510_v25  ;;  %726 = vmatpush.msra.mxu2 %v510_v25 }
  0xb1   : > { %v955_v8 = vpop.f32.mrf.mxu0 }
  0xb2   : > { %486 = vrot.lane.b32.xlu1 %v955_v8, %s861_s28  ;;  %v701_v15 = vmul.f32 -1.442695, %v955_v8 }
  0xb4   : > { %767 = vpow2.f32 %v701_v15 }
  0xb7   : > { %v961_v12 = vpop.f32.mrf.mxu3 }
  0xb8   : > { %488 = vrot.lane.b32.xlu0 %v961_v12, %s861_s28  ;;  %v702_v16 = vmul.f32 -1.442695, %v961_v12 }
  0xba   : > { %498 = vperm.xlu1 %766, %v494_v13   ;;  %v768_v17 = vpop.eup %767  ;;  %769 = vpow2.f32 %v702_v16 }
  0xbb   : > { %v450_v20 = vadd.f32 1.0, %v768_v17 }
  0xbd   : > { %771 = vrcp.f32 %v450_v20  ;;  %vm457_vm2 = vweird.f32 %v450_v20  ;;  %v463_v33 = vand.u32 2147483648, %v450_v20  ;;  %v461_v35 = vand.u32 2147483647, %v450_v20 }
  0xbf   : > { %v464_v37 = vor.u32 1.1754944e-38, %v463_v33  ;;  %vm462_vm5 = vcmp.eq.f32.partialorder %v461_v35, 8.507059e+37 }
  0xc0   : > { %503 = vperm.xlu0 %765, %v495_v14   ;;  %v770_v22 = vpop.eup %769 }
  0xc1   : > { %v451_v24 = vadd.f32 1.0, %v770_v22 }
  0xc3   : > { %v772_v26 = vpop.eup %771  ;;  %773 = vrcp.f32 %v451_v24  ;;  %v478_v42 = vand.u32 2147483648, %v451_v24  ;;  %vm472_vm7 = vweird.f32 %v451_v24  ;;  %v476_v43 = vand.u32 2147483647, %v451_v24 }
  0xc4   : > { %v453_v27 = vmul.f32 %v772_v26, %v450_v20  ;;  %vm458_vm3 = vweird.f32 %v772_v26 }
  0xc5   : > { %vm459_vm4 = vmor %vm457_vm2, %vm458_vm3  ;;  %v479_v46 = vor.u32 1.1754944e-38, %v478_v42  ;;  %vm477_vm9 = vcmp.eq.f32.partialorder %v476_v43, 8.507059e+37 }
  0xc6   : > { %v454_v29 = vsub.f32 1.0, %v453_v27 }
  0xc8   : > { %v455_v31 = vmul.f32 %v772_v26, %v454_v29 }
  0xc9   : > { %v774_v28 = vpop.eup %773 }
  0xca   : > { %v468_v30 = vmul.f32 %v774_v28, %v451_v24  ;;  %v456_v34 = vadd.f32 %v772_v26, %v455_v31  ;;  %vm473_vm6 = vweird.f32 %v774_v28 }
  0xcb   : > { %vm474_vm8 = vmor %vm472_vm7, %vm473_vm6 }
  0xcc   : > { %v469_v32 = vsub.f32 1.0, %v468_v30  ;;  %v460_v38 = vsel %vm459_vm4, %v772_v26, %v456_v34 }
  0xcd   : > { %v465_v41 = vsel %vm462_vm5, %v464_v37, %v460_v38 }
  0xce   : > { %v470_v36 = vmul.f32 %v774_v28, %v469_v32  ;;  %v482_v44 = vmul.f32 %v465_v41, %v955_v8 }
  0xd0   : > { %v471_v40 = vadd.f32 %v774_v28, %v470_v36 }
  0xd2   : > { %v475_v45 = vsel %vm474_vm8, %v774_v28, %v471_v40 }
  0xd3   : > { %v480_v49 = vsel %vm477_vm9, %v479_v46, %v475_v45 }
  0xd4   : > { %v483_v52 = vmul.f32 %v480_v49, %v961_v12 }
 0x124   : > { %v487_v39 = vpop.permute.xlu1 %486 }
 0x125   : > { %v492_v48 = vmul.f32 %v487_v39, %v482_v44 }
 0x12a   : > { %v489_v47 = vpop.permute.xlu0 %488 }
 0x12b   : > { %v493_v53 = vmul.f32 %v489_v47, %v483_v52 }
 0x12c   : > { %v499_v50 = vpop.permute.xlu1 %498 }
 0x12d   : > { %v506_v51 = vmul.f32 %v499_v50, %v492_v48 }
 0x12f   : > { %703 = vmatmul.msk.f32.vlgmr.msra.gmra.mxu1 %vm518_vm10, %v506_v51 }
 0x132   : > { %v504_v54 = vpop.permute.xlu0 %503 }
 0x133   : > { %v507_v55 = vmul.f32 %v504_v54, %v493_v53 }
 0x135   : > { %704 = vmatmul.msk.f32.vlgmr.msra.gmra.mxu2 %vm518_vm10, %v507_v55 }
 0x1ac   : > { %v542_v57 = vpop.f32.mrf.mxu1 }
 0x1ad   : > { %v548_v58 = vadd.f32 %v542_v57, %v508_v56 }
 0x1af   : > { %550 = vst.msk [vmem:[#allocation2] sm:$0xff] %vm414_vm1, %v548_v58 }
 0x1b8   : > { %v545_v60 = vpop.f32.mrf.mxu2 }
 0x1b9   : > { %v549_v61 = vadd.f32 %v545_v60, %v509_v59 }
 0x1bb   : > { %551 = vst.msk [vmem:[#allocation2 + $0x8] sm:$0xff] %vm414_vm1, %v549_v61 }
 0x1bc PF: > { %p552_p9 = scmp.eq.s32.totalorder %s847_s29, 7 }
 0x1bd   : > { %v557_v62 = vld [vmem:[#allocation2] sm:$0xff] (%p552_p9)  ;;  %vm559_vm11 = vcmask (%p552_p9), 261120  }
 0x1be   : > { %556 = sbr.rel (!%p552_p9) target bundleno = 452 (0x1c4), region = 48  ;;  %560 = vst.msk [vmem:[#allocation6] sm:$0xff] (%p552_p9), %vm559_vm11, %v557_v62 }
 0x1c2   : > { %v558_v63 = vld [vmem:[#allocation2 + $0x8] sm:$0xff] (%p552_p9) }
 0x1c3   : > { %561 = vst.msk [vmem:[#allocation6 + $0x8] sm:$0xff] %vm559_vm11, %v558_v63 }
 0x1c4 PF: > { %p731_p10 = scmp.eq.s32.totalorder %s686_s0, 7  ;;  %s572_s10 = sshll.u32 %s997_s6, 4  ;;  %s573_s10 = int_to_ptr.hbm [resolvable:$true] %s572_s10 }
 0x1c5   : > { %s862_s11 = smov [#allocation6]   ;;  %s863_s13 = smov 128  }
 0x1c6   : > { %s570_s12 = sshll.u32 %s862_s11, 4  ;;  %s864_s29 = smov 8   ;;  %s571_s12 = int_to_ptr.vmem [resolvable:$true] %s570_s12 }
 0x1c7   : > { %728 = dma.vmem_to_hbm [thread:$0]  (%p731_p10), %s571_s12, 256, %s573_s10, [#allocation7], %s863_s13, %s863_s13, %s864_s29  }
 0x1c8   : > { %842 = dma.done.wait (%p731_p10), [#allocation7], 256  }
 0x1c9   : > { %844 = vsyncadd (%p731_p10), [#allocation7], 4294967040 }
 0x1ca PF: > { %s30_s7 = sadd.s32 1, %s855_s7   ;;  %s999_s29 = smov %s851_s30 }
 0x1cb   : > { %p27_p11 = scmp.ge.s32.totalorder %s30_s7, 10   ;;  %s1000_s30 = smov %s1002_s1 }
 0x1cd   :  { %29 = sbr.rel (!%p27_p11) target bundleno = 9 (0x9), region = 85 }
 0x1d2   :  { %589 = vsyncpa [#allocation7], 1 }
 0x1d3   :  { %591 = vsyncpa [#allocation7 + $0x1], 1 }

</bundles_post_ra>
